<compile_context>
chip_gen: v6e
topology: v6e:2x2x1
jax: 0.10.0
libtpu: 0.0.40
codegen_flags: <defaults>
</compile_context>

<pallas_src>
import jax
import jax.numpy as jnp
from jax.experimental import pallas as pl
from jax.experimental.pallas import tpu as pltpu


def _round_up(v, m):
    return -(-v // m) * m


def _pick_tile(dim, target, align):
    """Pick a tile size for one dim.

    Returns (tile, padded_dim). Full-extent blocks (tile == dim) are always
    legal; otherwise the tile is a multiple of `align` (keeps output stores
    lane-dense / satisfies the (8,128) block rule). If no reasonable aligned
    divisor exists, the dim is padded up and the caller zero-pads the operand.
    """
    if dim <= target:
        return dim, dim  # full-extent block — always legal, no padding
    cap = max(align, (target // align) * align)
    lo = max(align, cap // 4)  # don't accept absurdly small tiles
    t = cap
    while t >= lo:
        if dim % t == 0:
            return t, dim
        t -= align
    return cap, _round_up(dim, cap)


def _make_single_k_kernel(compute_dtype):
    # Fast path: whole K reduction in one tile -> write the dot straight to
    # the output, no accumulator scratch, no zero-init, no extra VPU add.
    def kernel(y_ref, x_ref, o_ref):
        a = y_ref[...]
        b = x_ref[...]
        if compute_dtype is not None:
            a = a.astype(compute_dtype)
            b = b.astype(compute_dtype)
        o_ref[...] = jnp.dot(
            a, b, preferred_element_type=jnp.float32
        ).astype(o_ref.dtype)

    return kernel


def _make_acc_kernel(compute_dtype):
    def kernel(y_ref, x_ref, o_ref, acc_ref):
        a = y_ref[...]
        b = x_ref[...]
        if compute_dtype is not None:
            a = a.astype(compute_dtype)
            b = b.astype(compute_dtype)
        partial = jnp.dot(a, b, preferred_element_type=jnp.float32)

        # First K step: overwrite (saves the zero-init pass over the tile).
        @pl.when(pl.program_id(2) == 0)
        def _():
            acc_ref[...] = partial

        # Remaining K steps: accumulate.
        @pl.when(pl.program_id(2) != 0)
        def _():
            acc_ref[...] += partial

        # Write back on the last K step.
        @pl.when(pl.program_id(2) == pl.num_programs(2) - 1)
        def _():
            o_ref[...] = acc_ref[...].astype(o_ref.dtype)

    return kernel


def swapped_matmul(x, y, *, tm=512, tn=512, tk=1024, compute_dtype=None):
    """Computes ModelWithSwappedInputs.forward(x, y) == y @ x.

    compute_dtype: optionally cast tiles (e.g. jnp.bfloat16) before the MXU
    dot for ~2-3x throughput on v6e/v7x; accumulation stays float32.
    """
    M, K = y.shape
    K2, N = x.shape
    assert K == K2, f"inner dims must match: {K} vs {K2}"

    # Tile selection (full-extent for small dims, aligned divisors otherwise,
    # zero-padding fallback instead of hard failure).
    tm, Mp = _pick_tile(M, tm, 8)     # sublane dim of y/out tiles
    tn, Np = _pick_tile(N, tn, 128)   # lane dim of x/out tiles
    tk, Kp = _pick_tile(K, tk, 128)   # lane dim of y tile / sublane dim of x

    yp = y if (Mp == M and Kp == K) else jnp.pad(y, ((0, Mp - M), (0, Kp - K)))
    xp = x if (Kp == K and Np == N) else jnp.pad(x, ((0, Kp - K), (0, Np - N)))

    kt = Kp // tk
    out_dtype = y.dtype
    elt = jnp.dtype(out_dtype).itemsize
    cost = pl.CostEstimate(
        flops=2 * Mp * Np * Kp,
        transcendentals=0,
        bytes_accessed=(Mp * Kp + Kp * Np + Mp * Np) * elt,
    )

    if kt == 1:
        out = pl.pallas_call(
            _make_single_k_kernel(compute_dtype),
            out_shape=jax.ShapeDtypeStruct((Mp, Np), out_dtype),
            grid_spec=pltpu.PrefetchScalarGridSpec(
                num_scalar_prefetch=0,
                grid=(Mp // tm, Np // tn),
                in_specs=[
                    pl.BlockSpec((tm, Kp), lambda i, j: (i, 0)),  # y tile
                    pl.BlockSpec((Kp, tn), lambda i, j: (0, j)),  # x tile
                ],
                out_specs=pl.BlockSpec((tm, tn), lambda i, j: (i, j)),
            ),
            compiler_params=pltpu.CompilerParams(
                dimension_semantics=("parallel", "parallel")
            ),
            cost_estimate=cost,
        )(yp, xp)
    else:
        out = pl.pallas_call(
            _make_acc_kernel(compute_dtype),
            out_shape=jax.ShapeDtypeStruct((Mp, Np), out_dtype),
            grid_spec=pltpu.PrefetchScalarGridSpec(
                num_scalar_prefetch=0,
                grid=(Mp // tm, Np // tn, kt),
                in_specs=[
                    pl.BlockSpec((tm, tk), lambda i, j, k: (i, k)),  # y tile
                    pl.BlockSpec((tk, tn), lambda i, j, k: (k, j)),  # x tile
                ],
                out_specs=pl.BlockSpec((tm, tn), lambda i, j, k: (i, j)),
                scratch_shapes=[pltpu.VMEM((tm, tn), jnp.float32)],
            ),
            compiler_params=pltpu.CompilerParams(
                dimension_semantics=("parallel", "parallel", "arbitrary")
            ),
            cost_estimate=cost,
        )(yp, xp)

    if Mp != M or Np != N:
        out = out[:M, :N]
    return out


if __name__ == "__main__":
    key = jax.random.PRNGKey(0)
    kx, ky, kx2, ky2 = jax.random.split(key, 4)

    # Test 1: small shapes, exercises the single-K fast path.
    # y: [M, K] = [128, 256], x: [K, N] = [256, 128].
    M, K, N = 128, 256, 128
    x = jax.random.normal(kx, (K, N), dtype=jnp.float32)
    y = jax.random.normal(ky, (M, K), dtype=jnp.float32)

    out = jax.block_until_ready(swapped_matmul(x, y))
    ref = y @ x
    assert out.shape == (M, N)
    assert jnp.allclose(out, ref, atol=1e-4, rtol=1e-4), "mismatch (fast path)"

    # Test 2: K larger than one tile -> exercises the accumulator (K-loop) path.
    # y: [256, 2048], x: [2048, 256]  (tk=1024 -> 2 K steps).
    M2, K2_, N2 = 256, 2048, 256
    x2 = jax.random.normal(kx2, (K2_, N2), dtype=jnp.float32)
    y2 = jax.random.normal(ky2, (M2, K2_), dtype=jnp.float32)

    out2 = jax.block_until_ready(swapped_matmul(x2, y2))
    ref2 = jnp.matmul(y2, x2, precision=jax.lax.Precision.HIGHEST)
    rel_err = jnp.max(jnp.abs(out2 - ref2)) / (jnp.max(jnp.abs(ref2)) + 1e-6)
    assert out2.shape == (M2, N2)
    assert rel_err < 2e-3, f"mismatch (acc path), rel_err={rel_err}"

    # Test 3: non-aligned shape -> exercises padding fallback.
    M3, K3, N3 = 100, 300, 60
    x3 = jax.random.normal(kx, (K3, N3), dtype=jnp.float32)
    y3 = jax.random.normal(ky, (M3, K3), dtype=jnp.float32)
    out3 = jax.block_until_ready(swapped_matmul(x3, y3))
    ref3 = y3 @ x3
    assert out3.shape == (M3, N3)
    assert jnp.allclose(out3, ref3, atol=1e-4, rtol=1e-4), "mismatch (padded path)"

    print("KERNEL_OK")
</pallas_src>

<mosaic_0001>
module attributes {stable_mosaic.version = 11 : i64} {
  func.func @kernel(%arg0: i32, %arg1: i32, %arg2: memref<128x256xf32, #tpu.memory_space<vmem>>, %arg3: memref<256x128xf32, #tpu.memory_space<vmem>>, %arg4: memref<128x128xf32, #tpu.memory_space<vmem>>) attributes {dimension_semantics = [#tpu.dimension_semantics<parallel>, #tpu.dimension_semantics<parallel>], iteration_bounds = array<i64: 1, 1>, scalar_prefetch = 0 : i64, scratch_operands = 0 : i64, tpu.core_type = #tpu.core_type<tc>, window_params = [{transform_indices = @transform_0, window_bounds = array<i64: 128, 256>}, {transform_indices = @transform_1, window_bounds = array<i64: 256, 128>}, {transform_indices = @transform_2, window_bounds = array<i64: 128, 128>}]} {
    %c0 = arith.constant 0 : index
    %c0_0 = arith.constant 0 : index
    %0 = vector.load %arg2[%c0, %c0_0] : memref<128x256xf32, #tpu.memory_space<vmem>>, vector<128x256xf32>
    %c0_1 = arith.constant 0 : index
    %c0_2 = arith.constant 0 : index
    %1 = vector.load %arg3[%c0_1, %c0_2] : memref<256x128xf32, #tpu.memory_space<vmem>>, vector<256x128xf32>
    %cst = arith.constant dense<0.000000e+00> : vector<128x128xf32>
    %2 = tpu.matmul %0, %1, %cst {dimension_numbers = #tpu.dot_dimension_numbers<[1], [0], [0], [1], [0, 0, 1, 1], [], []>} : vector<128x256xf32>, vector<256x128xf32>, vector<128x128xf32> -> vector<128x128xf32>
    %c0_3 = arith.constant 0 : index
    %c0_4 = arith.constant 0 : index
    %3 = vector.load %arg4[%c0_3, %c0_4] : memref<128x128xf32, #tpu.memory_space<vmem>>, vector<128x128xf32>
    tpu.vector_store %arg4[%c0_3, %c0_4], %2 {strides = array<i32>} : memref<128x128xf32, #tpu.memory_space<vmem>>, vector<128x128xf32>,
    return
  }
  func.func @transform_0(%arg0: i32, %arg1: i32) -> (i32, i32) {
    %c0_i32 = arith.constant 0 : i32
    %c0_i32_0 = arith.constant 0 : i32
    return %arg0, %c0_i32 : i32, i32
  }
  func.func @transform_1(%arg0: i32, %arg1: i32) -> (i32, i32) {
    %c0_i32 = arith.constant 0 : i32
    %c0_i32_0 = arith.constant 0 : i32
    return %c0_i32, %arg1 : i32, i32
  }
  func.func @transform_2(%arg0: i32, %arg1: i32) -> (i32, i32) {
    %c0_i32 = arith.constant 0 : i32
    return %arg0, %arg1 : i32, i32
  }
}

</mosaic_0001>

<bundles_post_ra>
// kernel: tpu_custom_call.1
= control target key start
LH: loop header
LB: loop body
LE: loop exit
PB: predicated region body
PF: predicated region fallthrough
CT: control target
= control target key end

     0   :  { %7 = vsyncpa [#allocation3], 0  ;;  %s505_s0 = inlined_call_operand.hbm [shape: f32[128,256], index: 0, kind: input, shape index: {}]   ;;  %s506_s1 = inlined_call_operand.hbm [shape: f32[256,128], index: 1, kind: input, shape index: {}]   ;;  %s507_s2 = inlined_call_operand.hbm [shape: f32[128,128], index: 2, kind: output, shape index: {}]  }
   0x1   :  { %8 = vsyncpa [#allocation6], 0 }
   0x2   :  { %9 = vsyncpa [#allocation4], 0  ;;  %s468_s9 = smov [#allocation2]  }
   0x3   :  { %s15_s10 = sshll.u32 %s468_s9, 4  ;;  %s16_s10 = int_to_ptr.vmem [resolvable:$true] %s15_s10 }
   0x4   :  { %s410_s11 = scalar_lea.vmem %s16_s10, 4096  ;;  %p415_p1 = scmp.lt.s32.totalorder %s16_s10, %s16_s10 }
   0x5   :  { %p411_p0 = scmp.ne.s32.totalorder %s16_s10, %s410_s11  ;;  %p416_p2 = scmp.lt.s32.totalorder %s410_s11, %s410_s11 }
   0x7   :  { %p417_p3 = por %p416_p2, %p415_p1 }
   0x9   :  { %p418_p4 = pnand %p417_p3, %p411_p0 }
   0xb   :  { %421 = shalt.err (!%p418_p4)
}
   0xc   :  { %s469_s12 = smov 256   ;;  %s470_s13 = smov 16  }
   0xd   :  { %21 = dma.hbm_to_vmem [thread:$0]  %s505_s0, 4096, %s16_s10, [#allocation3], %s469_s12, %s469_s12, %s470_s13  }
   0xe   :  { %s471_s16 = smov [#allocation5]  }
   0xf   :  { %s27_s17 = sshll.u32 %s471_s16, 4  ;;  %s28_s17 = int_to_ptr.vmem [resolvable:$true] %s27_s17 }
  0x10   :  { %s430_s18 = scalar_lea.vmem %s28_s17, 4096  ;;  %p435_p6 = scmp.lt.s32.totalorder %s28_s17, %s28_s17 }
  0x11   :  { %p431_p5 = scmp.ne.s32.totalorder %s28_s17, %s430_s18  ;;  %p436_p7 = scmp.lt.s32.totalorder %s430_s18, %s430_s18 }
  0x13   :  { %p437_p8 = por %p436_p7, %p435_p6 }
  0x15   :  { %p438_p9 = pnand %p437_p8, %p431_p5 }
  0x17   :  { %441 = shalt.err (!%p438_p9)
}
  0x18   :  { %s472_s19 = smov 128   ;;  %s473_s20 = smov 8  }
  0x19   :  { %33 = dma.hbm_to_vmem [thread:$0]  %s506_s1, 4096, %s28_s17, [#allocation6], %s472_s19, %s472_s19, %s473_s20  }
  0x1a   :  { %462 = dma.done.wait [#allocation3], 4096  }
  0x1b   :  { %463 = vsyncadd [#allocation3], 4294963200 }
  0x1c   :  { %464 = dma.done.wait [#allocation6], 4096  }
  0x1d   :  { %465 = vsyncadd [#allocation6], 4294963200  ;;  %v103_v0 = vld [vmem:[#allocation5 + $0xf8] sm:$0xff]  ;;  %v102_v2 = vld [vmem:[#allocation5 + $0xf0] sm:$0xff]  ;;  %s474_s0 = smov [#allocation7]  }
  0x1e   :  { %v87_v1 = vld [vmem:[#allocation5 + $0x78] sm:$0xff]  ;;  %283 = vmatprep.subr.mxu0 %v103_v0  ;;  %363 = vmatprep.subr.mxu1 %v103_v0  ;;  %v86_v3 = vld [vmem:[#allocation5 + $0x70] sm:$0xff]  ;;  %v101_v4 = vld [vmem:[#allocation5 + $0xe8] sm:$0xff]  ;;  %s270_s1 = sshll.u32 %s474_s0, 4  ;;  %s271_s1 = int_to_ptr.vmem [resolvable:$true] %s270_s1 }
  0x1f   :  { %284 = vmatpush3.msra.mxu0 %v87_v1  ;;  %379 = vmatpush3.msra.mxu1 %v87_v1  ;;  %v85_v5 = vld [vmem:[#allocation5 + $0x68] sm:$0xff]  ;;  %v100_v6 = vld [vmem:[#allocation5 + $0xe0] sm:$0xff]  ;;  %v99_v8 = vld [vmem:[#allocation5 + $0xd8] sm:$0xff]  ;;  %s442_s23 = scalar_lea.vmem %s271_s1, 2048  ;;  %p447_p11 = scmp.lt.s32.totalorder %s271_s1, %s271_s1 }
  0x20   :  { %285 = vmatprep.subr.mxu0 %v102_v2  ;;  %364 = vmatprep.subr.mxu1 %v102_v2  ;;  %v84_v7 = vld [vmem:[#allocation5 + $0x60] sm:$0xff]  ;;  %v83_v9 = vld [vmem:[#allocation5 + $0x58] sm:$0xff]  ;;  %v98_v10 = vld [vmem:[#allocation5 + $0xd0] sm:$0xff]  ;;  %p443_p10 = scmp.ne.s32.totalorder %s271_s1, %s442_s23  ;;  %p448_p12 = scmp.lt.s32.totalorder %s442_s23, %s442_s23 }
  0x21   :  { %286 = vmatpush3.msra.mxu0 %v86_v3  ;;  %380 = vmatpush3.msra.mxu1 %v86_v3  ;;  %v82_v11 = vld [vmem:[#allocation5 + $0x50] sm:$0xff]  ;;  %v97_v12 = vld [vmem:[#allocation5 + $0xc8] sm:$0xff]  ;;  %v96_v14 = vld [vmem:[#allocation5 + $0xc0] sm:$0xff] }
  0x22   :  { %287 = vmatprep.subr.mxu0 %v101_v4  ;;  %365 = vmatprep.subr.mxu1 %v101_v4  ;;  %v81_v13 = vld [vmem:[#allocation5 + $0x48] sm:$0xff]  ;;  %v80_v15 = vld [vmem:[#allocation5 + $0x40] sm:$0xff]  ;;  %v95_v16 = vld [vmem:[#allocation5 + $0xb8] sm:$0xff]  ;;  %p449_p13 = por %p448_p12, %p447_p11 }
  0x23   :  { %288 = vmatpush3.msra.mxu0 %v85_v5  ;;  %381 = vmatpush3.msra.mxu1 %v85_v5  ;;  %v79_v17 = vld [vmem:[#allocation5 + $0x38] sm:$0xff]  ;;  %v94_v18 = vld [vmem:[#allocation5 + $0xb0] sm:$0xff]  ;;  %v93_v20 = vld [vmem:[#allocation5 + $0xa8] sm:$0xff] }
  0x24   :  { %289 = vmatprep.subr.mxu0 %v100_v6  ;;  %366 = vmatprep.subr.mxu1 %v100_v6  ;;  %v78_v19 = vld [vmem:[#allocation5 + $0x30] sm:$0xff]  ;;  %v77_v21 = vld [vmem:[#allocation5 + $0x28] sm:$0xff]  ;;  %v92_v22 = vld [vmem:[#allocation5 + $0xa0] sm:$0xff]  ;;  %p450_p0 = pnand %p449_p13, %p443_p10 }
  0x25   :  { %290 = vmatpush3.msra.mxu0 %v84_v7  ;;  %382 = vmatpush3.msra.mxu1 %v84_v7  ;;  %v76_v23 = vld [vmem:[#allocation5 + $0x20] sm:$0xff]  ;;  %v91_v24 = vld [vmem:[#allocation5 + $0x98] sm:$0xff]  ;;  %v90_v26 = vld [vmem:[#allocation5 + $0x90] sm:$0xff] }
  0x26   :  { %291 = vmatprep.subr.mxu0 %v99_v8  ;;  %367 = vmatprep.subr.mxu1 %v99_v8  ;;  %v75_v25 = vld [vmem:[#allocation5 + $0x18] sm:$0xff]  ;;  %v74_v27 = vld [vmem:[#allocation5 + $0x10] sm:$0xff]  ;;  %v89_v28 = vld [vmem:[#allocation5 + $0x88] sm:$0xff] }
  0x27   :  { %292 = vmatpush3.msra.mxu0 %v83_v9  ;;  %383 = vmatpush3.msra.mxu1 %v83_v9  ;;  %v73_v29 = vld [vmem:[#allocation5 + $0x8] sm:$0xff]  ;;  %v88_v30 = vld [vmem:[#allocation5 + $0x80] sm:$0xff]  ;;  %v43_v36 = vld [vmem:[#allocation2 + $0x18] sm:$0xff] }
  0x28   :  { %293 = vmatprep.subr.mxu0 %v98_v10  ;;  %368 = vmatprep.subr.mxu1 %v98_v10  ;;  %v72_v31 = vld [vmem:[#allocation5] sm:$0xff]  ;;  %v41_v32 = vld [vmem:[#allocation2 + $0x8] sm:$0xff]  ;;  %v59_v37 = vld [vmem:[#allocation2 + $0x98] sm:$0xff] }
  0x29   :  { %294 = vmatpush3.msra.mxu0 %v82_v11  ;;  %384 = vmatpush3.msra.mxu1 %v82_v11  ;;  %v57_v33 = vld [vmem:[#allocation2 + $0x88] sm:$0xff]  ;;  %v40_v34 = vld [vmem:[#allocation2] sm:$0xff]  ;;  %v42_v38 = vld [vmem:[#allocation2 + $0x10] sm:$0xff] }
  0x2a   :  { %295 = vmatprep.subr.mxu0 %v97_v12  ;;  %369 = vmatprep.subr.mxu1 %v97_v12  ;;  %v56_v35 = vld [vmem:[#allocation2 + $0x80] sm:$0xff]  ;;  %v58_v39 = vld [vmem:[#allocation2 + $0x90] sm:$0xff]  ;;  %v45_v40 = vld [vmem:[#allocation2 + $0x28] sm:$0xff] }
  0x2b   :  { %296 = vmatpush3.msra.mxu0 %v81_v13  ;;  %385 = vmatpush3.msra.mxu1 %v81_v13  ;;  %v61_v41 = vld [vmem:[#allocation2 + $0xa8] sm:$0xff]  ;;  %v44_v42 = vld [vmem:[#allocation2 + $0x20] sm:$0xff]  ;;  %v47_v44 = vld [vmem:[#allocation2 + $0x38] sm:$0xff] }
  0x2c   :  { %297 = vmatprep.subr.mxu0 %v96_v14  ;;  %370 = vmatprep.subr.mxu1 %v96_v14  ;;  %v60_v43 = vld [vmem:[#allocation2 + $0xa0] sm:$0xff]  ;;  %v63_v45 = vld [vmem:[#allocation2 + $0xb8] sm:$0xff]  ;;  %v46_v46 = vld [vmem:[#allocation2 + $0x30] sm:$0xff] }
  0x2d   :  { %298 = vmatpush3.msra.mxu0 %v80_v15  ;;  %386 = vmatpush3.msra.mxu1 %v80_v15  ;;  %v62_v47 = vld [vmem:[#allocation2 + $0xb0] sm:$0xff]  ;;  %v49_v48 = vld [vmem:[#allocation2 + $0x48] sm:$0xff]  ;;  %v48_v50 = vld [vmem:[#allocation2 + $0x40] sm:$0xff] }
  0x2e   :  { %299 = vmatprep.subr.mxu0 %v95_v16  ;;  %371 = vmatprep.subr.mxu1 %v95_v16  ;;  %v65_v49 = vld [vmem:[#allocation2 + $0xc8] sm:$0xff]  ;;  %v64_v51 = vld [vmem:[#allocation2 + $0xc0] sm:$0xff]  ;;  %v51_v52 = vld [vmem:[#allocation2 + $0x58] sm:$0xff] }
  0x2f   :  { %300 = vmatpush3.msra.mxu0 %v79_v17  ;;  %387 = vmatpush3.msra.mxu1 %v79_v17  ;;  %v67_v53 = vld [vmem:[#allocation2 + $0xd8] sm:$0xff]  ;;  %v50_v54 = vld [vmem:[#allocation2 + $0x50] sm:$0xff]  ;;  %v53_v56 = vld [vmem:[#allocation2 + $0x68] sm:$0xff] }
  0x30   :  { %301 = vmatprep.subr.mxu0 %v94_v18  ;;  %372 = vmatprep.subr.mxu1 %v94_v18  ;;  %v66_v55 = vld [vmem:[#allocation2 + $0xd0] sm:$0xff]  ;;  %v69_v57 = vld [vmem:[#allocation2 + $0xe8] sm:$0xff]  ;;  %v52_v58 = vld [vmem:[#allocation2 + $0x60] sm:$0xff] }
  0x31   :  { %302 = vmatpush3.msra.mxu0 %v78_v19  ;;  %388 = vmatpush3.msra.mxu1 %v78_v19  ;;  %v68_v59 = vld [vmem:[#allocation2 + $0xe0] sm:$0xff]  ;;  %v55_v60 = vld [vmem:[#allocation2 + $0x78] sm:$0xff]  ;;  %v54_v62 = vld [vmem:[#allocation2 + $0x70] sm:$0xff] }
  0x32   :  { %303 = vmatprep.subr.mxu0 %v93_v20  ;;  %373 = vmatprep.subr.mxu1 %v93_v20  ;;  %v71_v61 = vld [vmem:[#allocation2 + $0xf8] sm:$0xff]  ;;  %v70_v63 = vld [vmem:[#allocation2 + $0xf0] sm:$0xff] }
  0x33   :  { %304 = vmatpush3.msra.mxu0 %v77_v21  ;;  %389 = vmatpush3.msra.mxu1 %v77_v21 }
  0x34   :  { %305 = vmatprep.subr.mxu0 %v92_v22  ;;  %374 = vmatprep.subr.mxu1 %v92_v22 }
  0x35   :  { %306 = vmatpush3.msra.mxu0 %v76_v23  ;;  %390 = vmatpush3.msra.mxu1 %v76_v23 }
  0x36   :  { %307 = vmatprep.subr.mxu0 %v91_v24  ;;  %375 = vmatprep.subr.mxu1 %v91_v24 }
  0x37   :  { %308 = vmatpush3.msra.mxu0 %v75_v25  ;;  %391 = vmatpush3.msra.mxu1 %v75_v25 }
  0x38   :  { %309 = vmatprep.subr.mxu0 %v90_v26  ;;  %376 = vmatprep.subr.mxu1 %v90_v26 }
  0x39   :  { %310 = vmatpush3.msra.mxu0 %v74_v27  ;;  %392 = vmatpush3.msra.mxu1 %v74_v27 }
  0x3a   :  { %311 = vmatprep.subr.mxu0 %v89_v28  ;;  %377 = vmatprep.subr.mxu1 %v89_v28 }
  0x3b   :  { %312 = vmatpush3.msra.mxu0 %v73_v29  ;;  %393 = vmatpush3.msra.mxu1 %v73_v29 }
  0x3c   :  { %313 = vmatprep.subr.mxu0 %v88_v30  ;;  %378 = vmatprep.subr.mxu1 %v88_v30 }
  0x3d   :  { %314 = vmatpush3.msra.mxu0 %v72_v31  ;;  %394 = vmatpush3.msra.mxu1 %v72_v31 }
  0x3e   :  { %168 = vmatprep.mubr.f32.mxu0 %v41_v32  ;;  %208 = vmatprep.mubr.f32.mxu1 %v57_v33 }
  0x3f   :  { %169 = vmatmul.mubr.f32.vlgmr.msra.gmra.mxu0 %v40_v34  ;;  %209 = vmatmul.mubr.f32.vlgmr.msra.gmra.mxu1 %v56_v35 }
  0x40   :  { %173 = vmatprep.mubr.f32.mxu0 %v43_v36  ;;  %213 = vmatprep.mubr.f32.mxu1 %v59_v37 }
  0x43   :  { %174 = vmatmul.mubr.f32.gmra.mxu0 %v42_v38  ;;  %214 = vmatmul.mubr.f32.gmra.mxu1 %v58_v39 }
  0x44   :  { %178 = vmatprep.mubr.f32.mxu0 %v45_v40  ;;  %218 = vmatprep.mubr.f32.mxu1 %v61_v41 }
  0x47   :  { %179 = vmatmul.mubr.f32.gmra.mxu0 %v44_v42  ;;  %219 = vmatmul.mubr.f32.gmra.mxu1 %v60_v43 }
  0x48   :  { %183 = vmatprep.mubr.f32.mxu0 %v47_v44  ;;  %223 = vmatprep.mubr.f32.mxu1 %v63_v45 }
  0x4b   :  { %184 = vmatmul.mubr.f32.gmra.mxu0 %v46_v46  ;;  %224 = vmatmul.mubr.f32.gmra.mxu1 %v62_v47 }
  0x4c   :  { %188 = vmatprep.mubr.f32.mxu0 %v49_v48  ;;  %228 = vmatprep.mubr.f32.mxu1 %v65_v49 }
  0x4f   :  { %189 = vmatmul.mubr.f32.gmra.mxu0 %v48_v50  ;;  %229 = vmatmul.mubr.f32.gmra.mxu1 %v64_v51 }
  0x50   :  { %193 = vmatprep.mubr.f32.mxu0 %v51_v52  ;;  %233 = vmatprep.mubr.f32.mxu1 %v67_v53 }
  0x53   :  { %194 = vmatmul.mubr.f32.gmra.mxu0 %v50_v54  ;;  %234 = vmatmul.mubr.f32.gmra.mxu1 %v66_v55 }
  0x54   :  { %198 = vmatprep.mubr.f32.mxu0 %v53_v56  ;;  %238 = vmatprep.mubr.f32.mxu1 %v69_v57 }
  0x57   :  { %199 = vmatmul.mubr.f32.gmra.mxu0 %v52_v58  ;;  %239 = vmatmul.mubr.f32.gmra.mxu1 %v68_v59 }
  0x58   :  { %203 = vmatprep.mubr.f32.mxu0 %v55_v60  ;;  %243 = vmatprep.mubr.f32.mxu1 %v71_v61 }
  0x5b   :  { %204 = vmatmul.mubr.f32.gmra.mxu0 %v54_v62  ;;  %244 = vmatmul.mubr.f32.gmra.mxu1 %v70_v63 }
  0xff   :  { %v315_v0 = vpop.f32.mrf.mxu0  ;;  %v339_v1 = vpop.f32.mrf.mxu1 }
 0x101   :  { %v316_v2 = vpop.f32.mrf.mxu0  ;;  %v340_v3 = vpop.f32.mrf.mxu1 }
 0x102   :  { %v317_v4 = vadd.f32 %v316_v2, %v315_v0  ;;  %v341_v5 = vadd.f32 %v340_v3, %v339_v1 }
 0x103   :  { %v318_v6 = vpop.f32.mrf.mxu0  ;;  %v342_v7 = vpop.f32.mrf.mxu1 }
 0x104   :  { %249 = vst [vmem:[#allocation7] sm:$0xff] %v317_v4  ;;  %257 = vst [vmem:[#allocation7 + $0x40] sm:$0xff] %v341_v5 }
 0x105   :  { %v319_v8 = vpop.f32.mrf.mxu0  ;;  %v343_v9 = vpop.f32.mrf.mxu1 }
 0x106   :  { %v320_v10 = vadd.f32 %v319_v8, %v318_v6  ;;  %v344_v11 = vadd.f32 %v343_v9, %v342_v7 }
 0x107   :  { %v321_v12 = vpop.f32.mrf.mxu0  ;;  %v345_v13 = vpop.f32.mrf.mxu1 }
 0x108   :  { %250 = vst [vmem:[#allocation7 + $0x8] sm:$0xff] %v320_v10  ;;  %258 = vst [vmem:[#allocation7 + $0x48] sm:$0xff] %v344_v11 }
 0x109   :  { %v322_v14 = vpop.f32.mrf.mxu0  ;;  %v346_v15 = vpop.f32.mrf.mxu1 }
 0x10a   :  { %v323_v16 = vadd.f32 %v322_v14, %v321_v12  ;;  %v347_v17 = vadd.f32 %v346_v15, %v345_v13 }
 0x10b   :  { %v324_v18 = vpop.f32.mrf.mxu0  ;;  %v348_v19 = vpop.f32.mrf.mxu1 }
 0x10c   :  { %251 = vst [vmem:[#allocation7 + $0x10] sm:$0xff] %v323_v16  ;;  %259 = vst [vmem:[#allocation7 + $0x50] sm:$0xff] %v347_v17 }
 0x10d   :  { %v325_v20 = vpop.f32.mrf.mxu0  ;;  %v349_v21 = vpop.f32.mrf.mxu1 }
 0x10e   :  { %v326_v22 = vadd.f32 %v325_v20, %v324_v18  ;;  %v350_v23 = vadd.f32 %v349_v21, %v348_v19 }
 0x10f   :  { %v327_v24 = vpop.f32.mrf.mxu0  ;;  %v351_v25 = vpop.f32.mrf.mxu1 }
 0x110   :  { %252 = vst [vmem:[#allocation7 + $0x18] sm:$0xff] %v326_v22  ;;  %260 = vst [vmem:[#allocation7 + $0x58] sm:$0xff] %v350_v23 }
 0x111   :  { %v328_v26 = vpop.f32.mrf.mxu0  ;;  %v352_v27 = vpop.f32.mrf.mxu1 }
 0x112   :  { %v329_v28 = vadd.f32 %v328_v26, %v327_v24  ;;  %v353_v29 = vadd.f32 %v352_v27, %v351_v25 }
 0x113   :  { %v330_v30 = vpop.f32.mrf.mxu0  ;;  %v354_v31 = vpop.f32.mrf.mxu1 }
 0x114   :  { %253 = vst [vmem:[#allocation7 + $0x20] sm:$0xff] %v329_v28  ;;  %261 = vst [vmem:[#allocation7 + $0x60] sm:$0xff] %v353_v29 }
 0x115   :  { %v331_v32 = vpop.f32.mrf.mxu0  ;;  %v355_v33 = vpop.f32.mrf.mxu1 }
 0x116   :  { %v332_v34 = vadd.f32 %v331_v32, %v330_v30  ;;  %v356_v35 = vadd.f32 %v355_v33, %v354_v31 }
 0x117   :  { %v333_v36 = vpop.f32.mrf.mxu0  ;;  %v357_v37 = vpop.f32.mrf.mxu1 }
 0x118   :  { %254 = vst [vmem:[#allocation7 + $0x28] sm:$0xff] %v332_v34  ;;  %262 = vst [vmem:[#allocation7 + $0x68] sm:$0xff] %v356_v35 }
 0x119   :  { %v334_v38 = vpop.f32.mrf.mxu0  ;;  %v358_v39 = vpop.f32.mrf.mxu1 }
 0x11a   :  { %v335_v40 = vadd.f32 %v334_v38, %v333_v36  ;;  %v359_v41 = vadd.f32 %v358_v39, %v357_v37 }
 0x11b   :  { %v336_v42 = vpop.f32.mrf.mxu0  ;;  %v360_v43 = vpop.f32.mrf.mxu1 }
 0x11c   :  { %255 = vst [vmem:[#allocation7 + $0x30] sm:$0xff] %v335_v40  ;;  %263 = vst [vmem:[#allocation7 + $0x70] sm:$0xff] %v359_v41 }
 0x11d   :  { %v337_v44 = vpop.f32.mrf.mxu0  ;;  %v361_v45 = vpop.f32.mrf.mxu1 }
 0x11e   :  { %v338_v46 = vadd.f32 %v337_v44, %v336_v42  ;;  %v362_v47 = vadd.f32 %v361_v45, %v360_v43 }
 0x120   :  { %256 = vst [vmem:[#allocation7 + $0x38] sm:$0xff] %v338_v46  ;;  %264 = vst [vmem:[#allocation7 + $0x78] sm:$0xff] %v362_v47 }
 0x121   :  { %453 = shalt.err (!%p450_p0)
}
 0x122   :  { %276 = dma.vmem_to_hbm [thread:$0]  %s271_s1, 2048, %s507_s2, [#allocation4], %s472_s19, %s472_s19, %s473_s20  }
 0x123   :  { %466 = dma.done.wait [#allocation4], 2048  }
 0x124   :  { %467 = vsyncadd [#allocation4], 4294965248 }
 0x125   :  { %280 = vsyncpa [#allocation3], 1 }
 0x126   :  { %281 = vsyncpa [#allocation6], 1 }
 0x127   :  { %282 = vsyncpa [#allocation4], 1 }

</bundles_post_ra>
